<compile_context>
chip_gen: v6e
topology: v6e:2x2x1
jax: 0.10.0
libtpu: 0.0.40
codegen_flags: <defaults>
</compile_context>

<pallas_src>
import numpy as np
import jax
import jax.numpy as jnp
from jax.experimental import pallas as pl
from jax.experimental.pallas import tpu as pltpu

_LANE = 128
_SUBLANE = 8


def _cdiv(a, b):
    return -(-a // b)


def _round_up(x, m):
    return ((x + m - 1) // m) * m


def _pad_to(a, shape):
    pads = [(0, s - d) for d, s in zip(a.shape, shape)]
    if any(p[1] for p in pads):
        return jnp.pad(a, pads)
    return a


def _device_kind():
    try:
        return jax.devices()[0].device_kind.lower()
    except Exception:
        return ""


def _act_dtype_for(compute_dtype):
    """bf16 bias-add/ReLU on chips with a bf16 VPU (v6e/v7x); f32 path for v5e or f32 compute."""
    if np.dtype(compute_dtype) == np.dtype(np.float32):
        return jnp.float32
    return jnp.float32 if "v5" in _device_kind() else compute_dtype


def _vmem_ceiling_bytes():
    """~75% of per-core physical VMEM (v7x ~48 MiB, v5e/v6e ~96 MiB); safe default 48 MiB."""
    cap = None
    try:  # narrow: only guards the hardware-info query, never a kernel compile.
        cap = getattr(pltpu.get_tpu_info(), "vmem_capacity_bytes", None)
    except Exception:
        cap = None
    if not cap:
        cap = 64 * 1024 * 1024
    return int(0.75 * cap)


def make_mlp_kernel(num_layers, bias_offsets, compute_dtype, act_dtype):
    """Fused MLP kernel. Args: (x_ref, packed_bias_ref, W0, ..., W_{L-1}, out_ref).

    Matmuls run on the MXU with f32 accumulation (preferred_element_type); bias-add / ReLU
    run in `act_dtype` (f32 on v5e, bf16 on v6e/v7x). ReLU after every layer except the last.
    """
    offs = bias_offsets
    act_is_f32 = np.dtype(act_dtype) == np.dtype(np.float32)

    def kernel(x_ref, b_ref, *refs):
        out_ref = refs[-1]
        w_refs = refs[:-1]
        h = x_ref[...].astype(compute_dtype)              # cast f32 -> compute dtype in-kernel
        for layer in range(num_layers):
            w = w_refs[layer][...]                        # compute_dtype, already padded
            b = b_ref[:, offs[layer]:offs[layer + 1]]     # f32, static lane-aligned slice
            acc = jnp.dot(h, w, preferred_element_type=jnp.float32)
            if layer < num_layers - 1:
                if act_is_f32:
                    # v5e-safe: bias-add + ReLU on the f32 VPU.
                    h = jnp.maximum(acc + b, 0.0).astype(compute_dtype)
                else:
                    # v6e/v7x: bf16 VPU path (halves VPU work / vreg footprint).
                    h = jnp.maximum(acc.astype(act_dtype) + b.astype(act_dtype), 0.0)
                    h = h.astype(compute_dtype)
            else:
                out_ref[...] = (acc + b).astype(out_ref.dtype)

    return kernel


def make_pipps_forward(weights, biases, *, compute_dtype=jnp.bfloat16,
                       batch_tile=2048, act_dtype=None):
    """Pad/cast the PIPPS MLP params once and return a jitted forward(x) -> [B, n_out]."""
    num_layers = len(weights)
    n_in = weights[0].shape[0]
    dims = [n_in] + [w.shape[1] for w in weights]
    n_out = dims[-1]
    if act_dtype is None:
        act_dtype = _act_dtype_for(compute_dtype)

    # K of the first matmul stays unpadded (MXU masks short K); every matmul N-dim /
    # activation width is lane-padded to 128 (zero padding keeps the math exact).
    pdims = [n_in] + [_round_up(d, _LANE) for d in dims[1:]]

    w_p = []
    for l, w in enumerate(weights):
        w32 = jnp.asarray(w, jnp.float32)
        w_p.append(_pad_to(w32, (pdims[l], pdims[l + 1])).astype(compute_dtype))
    b_p = jnp.concatenate(
        [_pad_to(jnp.asarray(b, jnp.float32).reshape(1, -1), (1, pdims[l + 1]))
         for l, b in enumerate(biases)], axis=1)

    offs = [0]
    for l in range(num_layers):
        offs.append(offs[-1] + pdims[l + 1])

    kernel = make_mlp_kernel(num_layers, offs, compute_dtype, act_dtype)

    param_bytes = sum(int(w.size) * w.dtype.itemsize for w in w_p) + int(b_p.size) * 4
    max_width = max(pdims)
    vmem_ceiling = _vmem_ceiling_bytes()

    def residency(t):
        # double-buffered x / out tiles + intermediate activations (f32 acc, bf16 copy, dot out)
        io = 2 * t * (n_in * 4 + pdims[-1] * 4)
        act = 3 * t * max_width * 4
        return io + act + 2 * param_bytes + (2 << 20)

    @jax.jit
    def forward(x):
        B = x.shape[0]

        # --- batch tiling (trace-time): big tile, >=2 grid steps when possible, VMEM-capped ---
        bt = _round_up(min(batch_tile, _round_up(B, _SUBLANE)), _SUBLANE)
        if bt >= B and B >= 2 * _SUBLANE:
            bt = _round_up(_cdiv(B, 2), _SUBLANE)     # >=2 tiles -> both v7x TCs get work
        while bt > _SUBLANE and residency(bt) > vmem_ceiling:
            bt = max(_SUBLANE, _round_up(bt // 2, _SUBLANE))
        num_tiles = _cdiv(B, bt)
        Bp = num_tiles * bt

        x_p = _pad_to(x.astype(jnp.float32), (Bp, n_in))   # row-pad only; no lane pad / pre-cast

        vmem_limit = int(min(max(2 * residency(bt), 32 << 20), vmem_ceiling))

        grid_invariant = lambda i: (0, 0)
        in_specs = [pl.BlockSpec((bt, n_in), lambda i: (i, 0)),     # x, tiled over batch
                    pl.BlockSpec(b_p.shape, grid_invariant)]        # packed biases (whole array)
        in_specs += [pl.BlockSpec(w.shape, grid_invariant) for w in w_p]   # weights (whole arrays)
        out_spec = pl.BlockSpec((bt, pdims[-1]), lambda i: (i, 0))  # lane-dense f32 output slab

        out_p = pl.pallas_call(
            kernel,
            out_shape=jax.ShapeDtypeStruct((Bp, pdims[-1]), jnp.float32),
            grid_spec=pltpu.PrefetchScalarGridSpec(
                num_scalar_prefetch=0,
                grid=(num_tiles,),
                in_specs=in_specs,
                out_specs=out_spec,
            ),
            compiler_params=pltpu.CompilerParams(
                dimension_semantics=("parallel",),   # batch axis shards across v7x TensorCores
                vmem_limit_bytes=vmem_limit,
            ),
        )(x_p, b_p, *w_p)

        return out_p[:B, :n_out]   # slice inside the same jit so XLA fuses it

    return forward


def init_pipps_params(key, n_in, hidden_w, depth, n_out):
    """Deterministic init mirroring PIPPS_policy.__init__ layer structure.

    Weights stored as [in, out] (transposed PyTorch convention).
    """
    dims = [n_in] + [hidden_w] * (depth + 1) + [n_out]
    weights, biases = [], []
    for l in range(len(dims) - 1):
        key, wk, bk = jax.random.split(key, 3)
        bound = 1.0 / jnp.sqrt(dims[l])
        w = jax.random.uniform(wk, (dims[l], dims[l + 1]), dtype=jnp.float32,
                               minval=-bound, maxval=bound)
        b = jax.random.uniform(bk, (1, dims[l + 1]), dtype=jnp.float32,
                               minval=-bound, maxval=bound)
        weights.append(w)
        biases.append(b)
    return weights, biases


def pipps_forward_reference(x, weights, biases, compute_dtype=jnp.float32,
                            act_dtype=jnp.float32):
    """Pure-JAX reference of PIPPS_policy.forward with matching precision policy."""
    act_is_f32 = np.dtype(act_dtype) == np.dtype(np.float32)
    prec = (jax.lax.Precision.HIGHEST
            if np.dtype(compute_dtype) == np.dtype(np.float32) else None)
    h = x.astype(compute_dtype)
    L = len(weights)
    for l, (w, b) in enumerate(zip(weights, biases)):
        acc = jnp.dot(h.astype(compute_dtype), w.astype(compute_dtype),
                      preferred_element_type=jnp.float32, precision=prec)
        b = jnp.asarray(b, jnp.float32).reshape(1, -1)
        if l < L - 1:
            if act_is_f32:
                h = jnp.maximum(acc + b, 0.0).astype(compute_dtype)
            else:
                h = jnp.maximum(acc.astype(act_dtype) + b.astype(act_dtype), 0.0)
                h = h.astype(compute_dtype)
        else:
            h = acc + b
    return h


if __name__ == "__main__":
    # Shapes consistent with the module: dx (n_in)=16, hid_width=32, hid_depth=2, du (n_out)=8.
    n_in, hidden_w, depth, n_out = 16, 32, 2, 8
    batch = 16

    key = jax.random.PRNGKey(0)
    key, xk = jax.random.split(key)
    x = jax.random.normal(xk, (batch, n_in), dtype=jnp.float32)
    weights, biases = init_pipps_params(key, n_in, hidden_w, depth, n_out)

    # Exact f32 path (matches the PyTorch module's f32 semantics).
    fwd_f32 = make_pipps_forward(weights, biases, compute_dtype=jnp.float32)
    out_f32 = jax.block_until_ready(fwd_f32(x))
    ref_f32 = pipps_forward_reference(x, weights, biases,
                                      compute_dtype=jnp.float32, act_dtype=jnp.float32)
    assert out_f32.shape == (batch, n_out)
    assert jnp.allclose(out_f32, ref_f32, atol=1e-4, rtol=1e-4), "f32 Pallas output mismatch"

    # Default bf16-operand / f32-accumulation MXU fast path (bf16 VPU on v6e/v7x, f32 VPU on v5e).
    act_dt = _act_dtype_for(jnp.bfloat16)
    fwd_bf16 = make_pipps_forward(weights, biases, compute_dtype=jnp.bfloat16)
    out_bf16 = jax.block_until_ready(fwd_bf16(x))
    ref_bf16 = pipps_forward_reference(x, weights, biases,
                                       compute_dtype=jnp.bfloat16, act_dtype=act_dt)
    assert out_bf16.shape == (batch, n_out)
    assert jnp.allclose(out_bf16, ref_bf16, atol=2e-3, rtol=2e-3), "bf16 Pallas output mismatch"

    # TODO(synk): predict()/gen_policy_rollout()/policy_step() depend on sklearn scalers, an
    # external dynamics model, stochastic rollouts and Adam updates; only the nn.Module forward
    # (the MLP) is implemented as a Pallas kernel here.
    print("KERNEL_OK")
</pallas_src>

<mosaic_0001>
module attributes {stable_mosaic.version = 11 : i64} {
  func.func @kernel(%arg0: i32, %arg1: memref<8x16xf32, #tpu.memory_space<vmem>>, %arg2: memref<1x512xf32, #tpu.memory_space<vmem>>, %arg3: memref<16x128xf32, #tpu.memory_space<vmem>>, %arg4: memref<128x128xf32, #tpu.memory_space<vmem>>, %arg5: memref<128x128xf32, #tpu.memory_space<vmem>>, %arg6: memref<128x128xf32, #tpu.memory_space<vmem>>, %arg7: memref<8x128xf32, #tpu.memory_space<vmem>>) attributes {dimension_semantics = [#tpu.dimension_semantics<parallel>], iteration_bounds = array<i64: 2>, scalar_prefetch = 0 : i64, scratch_operands = 0 : i64, tpu.core_type = #tpu.core_type<tc>, window_params = [{transform_indices = @transform_0, window_bounds = array<i64: 8, 16>}, {pipeline_mode = #tpu.pipeline_mode<synchronous>, transform_indices = @transform_1, window_bounds = array<i64: 1, 512>}, {pipeline_mode = #tpu.pipeline_mode<synchronous>, transform_indices = @transform_2, window_bounds = array<i64: 16, 128>}, {pipeline_mode = #tpu.pipeline_mode<synchronous>, transform_indices = @transform_3, window_bounds = array<i64: 128, 128>}, {pipeline_mode = #tpu.pipeline_mode<synchronous>, transform_indices = @transform_4, window_bounds = array<i64: 128, 128>}, {pipeline_mode = #tpu.pipeline_mode<synchronous>, transform_indices = @transform_5, window_bounds = array<i64: 128, 128>}, {transform_indices = @transform_6, window_bounds = array<i64: 8, 128>}]} {
    %c0 = arith.constant 0 : index
    %c0_0 = arith.constant 0 : index
    %0 = vector.load %arg1[%c0, %c0_0] : memref<8x16xf32, #tpu.memory_space<vmem>>, vector<8x16xf32>
    %c0_1 = arith.constant 0 : index
    %c0_2 = arith.constant 0 : index
    %1 = vector.load %arg3[%c0_1, %c0_2] : memref<16x128xf32, #tpu.memory_space<vmem>>, vector<16x128xf32>
    %c0_3 = arith.constant 0 : index
    %c0_4 = arith.constant 0 : index
    %2 = vector.load %arg2[%c0_3, %c0_4] : memref<1x512xf32, #tpu.memory_space<vmem>>, vector<1x128xf32>
    %cst = arith.constant dense<0.000000e+00> : vector<8x128xf32>
    %3 = tpu.matmul %0, %1, %cst {dimension_numbers = #tpu.dot_dimension_numbers<[1], [0], [0], [1], [0, 0, 1, 1], [], []>} : vector<8x16xf32>, vector<16x128xf32>, vector<8x128xf32> -> vector<8x128xf32>
    %4 = vector.broadcast %2 : vector<1x128xf32> to vector<8x128xf32>
    %5 = arith.addf %3, %4 : vector<8x128xf32>
    %cst_5 = arith.constant 0.000000e+00 : f32
    %6 = vector.broadcast %cst_5 : f32 to vector<8x128xf32>
    %7 = arith.maximumf %5, %6 : vector<8x128xf32>
    %c0_6 = arith.constant 0 : index
    %c0_7 = arith.constant 0 : index
    %8 = vector.load %arg4[%c0_6, %c0_7] : memref<128x128xf32, #tpu.memory_space<vmem>>, vector<128x128xf32>
    %c0_8 = arith.constant 0 : index
    %c128 = arith.constant 128 : index
    %9 = vector.load %arg2[%c0_8, %c128] : memref<1x512xf32, #tpu.memory_space<vmem>>, vector<1x128xf32>
    %cst_9 = arith.constant dense<0.000000e+00> : vector<8x128xf32>
    %10 = tpu.matmul %7, %8, %cst_9 {dimension_numbers = #tpu.dot_dimension_numbers<[1], [0], [0], [1], [0, 0, 1, 1], [], []>} : vector<8x128xf32>, vector<128x128xf32>, vector<8x128xf32> -> vector<8x128xf32>
    %11 = vector.broadcast %9 : vector<1x128xf32> to vector<8x128xf32>
    %12 = arith.addf %10, %11 : vector<8x128xf32>
    %cst_10 = arith.constant 0.000000e+00 : f32
    %13 = vector.broadcast %cst_10 : f32 to vector<8x128xf32>
    %14 = arith.maximumf %12, %13 : vector<8x128xf32>
    %c0_11 = arith.constant 0 : index
    %c0_12 = arith.constant 0 : index
    %15 = vector.load %arg5[%c0_11, %c0_12] : memref<128x128xf32, #tpu.memory_space<vmem>>, vector<128x128xf32>
    %c0_13 = arith.constant 0 : index
    %c256 = arith.constant 256 : index
    %16 = vector.load %arg2[%c0_13, %c256] : memref<1x512xf32, #tpu.memory_space<vmem>>, vector<1x128xf32>
    %cst_14 = arith.constant dense<0.000000e+00> : vector<8x128xf32>
    %17 = tpu.matmul %14, %15, %cst_14 {dimension_numbers = #tpu.dot_dimension_numbers<[1], [0], [0], [1], [0, 0, 1, 1], [], []>} : vector<8x128xf32>, vector<128x128xf32>, vector<8x128xf32> -> vector<8x128xf32>
    %18 = vector.broadcast %16 : vector<1x128xf32> to vector<8x128xf32>
    %19 = arith.addf %17, %18 : vector<8x128xf32>
    %cst_15 = arith.constant 0.000000e+00 : f32
    %20 = vector.broadcast %cst_15 : f32 to vector<8x128xf32>
    %21 = arith.maximumf %19, %20 : vector<8x128xf32>
    %c0_16 = arith.constant 0 : index
    %c0_17 = arith.constant 0 : index
    %22 = vector.load %arg6[%c0_16, %c0_17] : memref<128x128xf32, #tpu.memory_space<vmem>>, vector<128x128xf32>
    %c0_18 = arith.constant 0 : index
    %c384 = arith.constant 384 : index
    %23 = vector.load %arg2[%c0_18, %c384] : memref<1x512xf32, #tpu.memory_space<vmem>>, vector<1x128xf32>
    %cst_19 = arith.constant dense<0.000000e+00> : vector<8x128xf32>
    %24 = tpu.matmul %21, %22, %cst_19 {dimension_numbers = #tpu.dot_dimension_numbers<[1], [0], [0], [1], [0, 0, 1, 1], [], []>} : vector<8x128xf32>, vector<128x128xf32>, vector<8x128xf32> -> vector<8x128xf32>
    %25 = vector.broadcast %23 : vector<1x128xf32> to vector<8x128xf32>
    %26 = arith.addf %24, %25 : vector<8x128xf32>
    %c0_20 = arith.constant 0 : index
    %c0_21 = arith.constant 0 : index
    %27 = vector.load %arg7[%c0_20, %c0_21] : memref<8x128xf32, #tpu.memory_space<vmem>>, vector<8x128xf32>
    tpu.vector_store %arg7[%c0_20, %c0_21], %26 {strides = array<i32>} : memref<8x128xf32, #tpu.memory_space<vmem>>, vector<8x128xf32>,
    return
  }
  func.func @transform_0(%arg0: i32) -> (i32, i32) {
    %c0_i32 = arith.constant 0 : i32
    %c0_i32_0 = arith.constant 0 : i32
    return %arg0, %c0_i32 : i32, i32
  }
  func.func @transform_1(%arg0: i32) -> (i32, i32) {
    %c0_i32 = arith.constant 0 : i32
    %c0_i32_0 = arith.constant 0 : i32
    %c0_i32_1 = arith.constant 0 : i32
    return %c0_i32, %c0_i32_0 : i32, i32
  }
  func.func @transform_2(%arg0: i32) -> (i32, i32) {
    %c0_i32 = arith.constant 0 : i32
    %c0_i32_0 = arith.constant 0 : i32
    %c0_i32_1 = arith.constant 0 : i32
    return %c0_i32, %c0_i32_0 : i32, i32
  }
  func.func @transform_3(%arg0: i32) -> (i32, i32) {
    %c0_i32 = arith.constant 0 : i32
    %c0_i32_0 = arith.constant 0 : i32
    %c0_i32_1 = arith.constant 0 : i32
    return %c0_i32, %c0_i32_0 : i32, i32
  }
  func.func @transform_4(%arg0: i32) -> (i32, i32) {
    %c0_i32 = arith.constant 0 : i32
    %c0_i32_0 = arith.constant 0 : i32
    %c0_i32_1 = arith.constant 0 : i32
    return %c0_i32, %c0_i32_0 : i32, i32
  }
  func.func @transform_5(%arg0: i32) -> (i32, i32) {
    %c0_i32 = arith.constant 0 : i32
    %c0_i32_0 = arith.constant 0 : i32
    %c0_i32_1 = arith.constant 0 : i32
    return %c0_i32, %c0_i32_0 : i32, i32
  }
  func.func @transform_6(%arg0: i32) -> (i32, i32) {
    %c0_i32 = arith.constant 0 : i32
    %c0_i32_0 = arith.constant 0 : i32
    return %arg0, %c0_i32 : i32, i32
  }
}

</mosaic_0001>

<bundles_post_ra>
// kernel: forward.1
= control target key start
LH: loop header
LB: loop body
LE: loop exit
PB: predicated region body
PF: predicated region fallthrough
CT: control target
= control target key end

     0   :  { %11 = vsyncpa [#allocation3], 0  ;;  %s1600_s0 = inlined_call_operand.hbm [shape: f32[16,16], index: 0, kind: input, shape index: {}]   ;;  %s1601_s1 = inlined_call_operand.hbm [shape: f32[1,512], index: 1, kind: input, shape index: {}]   ;;  %s1602_s2 = inlined_call_operand.hbm [shape: f32[16,128], index: 2, kind: input, shape index: {}]   ;;  %s1603_s3 = inlined_call_operand.hbm [shape: f32[128,128], index: 3, kind: input, shape index: {}]   ;;  %s1604_s4 = inlined_call_operand.hbm [shape: f32[128,128], index: 4, kind: input, shape index: {}]   ;;  %s1605_s5 = inlined_call_operand.hbm [shape: f32[128,128], index: 5, kind: input, shape index: {}]   ;;  %s1606_s6 = inlined_call_operand.vmem [shape: f32[16,128], index: 6, kind: output, shape index: {}]  }
   0x1   :  { %13 = vsyncpa [#allocation3 + $0x1], 0 }
   0x2   :  { %14 = vsyncpa [#allocation5], 0 }
   0x3   :  { %15 = vsyncpa [#allocation8], 0 }
   0x4   :  { %16 = vsyncpa [#allocation11], 0  ;;  %s1354_s21 = smov 0   ;;  %s1356_s22 = smov 0  }
   0x5   :  { %s1358_s23 = smov 0   ;;  %s1360_s24 = smov 0  }
   0x6 LB: > { %s1309_s25 = smov [#allocation4]   ;;  %s1375_s27 = sadd.s32 4294967295, %s1307_s24   ;;  %s1307_s24 = sphi %s1360_s24, %s1626_s24   ;;  %s1303_s23 = sphi %s1358_s23, %s1625_s23   ;;  %s1299_s22 = sphi %s1356_s22, %s1624_s22   ;;  %s1295_s21 = sphi %s1354_s21, %s1623_s21  }
   0x7   : > { %s197_s26 = sshll.u32 %s1309_s25, 4  ;;  %p819_p0 = scmp.ge.s32.totalorder %s1307_s24, 1  ;;  %s198_s26 = int_to_ptr.vmem [resolvable:$true] %s197_s26 }
   0x8   : > { %p1607_p1 = scmp.eq.s32.totalorder %s1375_s27, 0  ;;  %p184_p2 = scmp.lt.s32.totalorder %s1307_s24, 3 }
   0x9   : > { %s1310_s29 = smov [#allocation7]   ;;  %s1311_s8 = smov [#allocation6]  }
   0xa   : > { %p1380_p3 = pnand %p819_p0, %p184_p2  ;;  %s220_s30 = sshll.u32 %s1310_s29, 4  ;;  %s1392_s30 = int_to_ptr.vmem [resolvable:$true] %s220_s30 }
   0xb   : > { %s207_s9 = sshll.u32 %s1311_s8, 4  ;;  %s1114_s11 = scalar_lea.vmem %s198_s26, 64  ;;  %s1394_s9 = int_to_ptr.vmem [resolvable:$true] %s207_s9 }
   0xc   : > { %s1610_s28 = scalar_select %p1380_p3, 1, 0 }
   0xd   : > { %p1031_p4 = pneg %p1380_p3  ;;  %p1115_p7 = scmp.ne.s32.totalorder %s198_s26, %s1114_s11 }
   0xe   : > { %p1122_p10 = scmp.lt.s32.totalorder %s198_s26, %s198_s26  ;;  %p1123_p11 = scmp.lt.s32.totalorder %s1114_s11, %s1114_s11 }
   0xf   : > { %p1388_p5 = pnand %p1031_p4, %p1607_p1 }
  0x10   : > { %p1124_p12 = por %p1123_p11, %p1122_p10 }
  0x11   : > { %p1398_p6 = pneg %p1388_p5 }
  0x13   : > { %p1117_p8 = pnand %p1115_p7, %p1398_p6 }
  0x15   : > { %p1118_p9 = pneg %p1117_p8 }
  0x17   : > { %p1125_p13 = pnand %p1124_p12, %p1118_p9 }
  0x19   : > { %1128 = shalt.err (!%p1125_p13)
}
  0x1a   : > { %1034 = dma.hbm_to_vmem [thread:$0]  (!%p1388_p5), %s1601_s1, 64, %s198_s26, [#allocation5]  }
  0x1b   : > { %s1140_s14 = scalar_lea.vmem %s1392_s30, 2048  ;;  %p1148_p7 = scmp.lt.s32.totalorder %s1392_s30, %s1392_s30 }
  0x1c   : > { %p1141_p0 = scmp.ne.s32.totalorder %s1392_s30, %s1140_s14  ;;  %p1149_p8 = scmp.lt.s32.totalorder %s1140_s14, %s1140_s14 }
  0x1e   : > { %p1143_p2 = pnand %p1141_p0, %p1398_p6  ;;  %p1150_p9 = por %p1149_p8, %p1148_p7 }
  0x20   : > { %p1144_p4 = pneg %p1143_p2 }
  0x22   : > { %p1151_p10 = pnand %p1150_p9, %p1144_p4 }
  0x24   : > { %1154 = shalt.err (!%p1151_p10)
}
  0x25   : > { %s1312_s15 = smov 128   ;;  %s1313_s16 = smov 8  }
  0x26   : > { %1040 = dma.hbm_to_vmem [thread:$0]  (!%p1388_p5), %s1603_s3, 2048, %s1392_s30, [#allocation8], %s1312_s15, %s1312_s15, %s1313_s16  }
  0x27   : > { %s1166_s19 = scalar_lea.vmem %s1394_s9, 256  ;;  %p1174_p0 = scmp.lt.s32.totalorder %s1394_s9, %s1394_s9 }
  0x28   : > { %p1167_p11 = scmp.ne.s32.totalorder %s1394_s9, %s1166_s19  ;;  %p1175_p2 = scmp.lt.s32.totalorder %s1166_s19, %s1166_s19 }
  0x2a   : > { %p1169_p12 = pnand %p1167_p11, %p1398_p6  ;;  %p1176_p4 = por %p1175_p2, %p1174_p0 }
  0x2c   : > { %p1170_p13 = pneg %p1169_p12 }
  0x2e   : > { %p1177_p7 = pnand %p1176_p4, %p1170_p13 }
  0x30   : > { %1180 = shalt.err (!%p1177_p7)
}
  0x31   : > { %1037 = dma.hbm_to_vmem [thread:$0]  (!%p1388_p5), %s1602_s2, 256, %s1394_s9, [#allocation5], %s1312_s15, %s1312_s15, %s1313_s16  }
  0x32   : > { %s1314_s26 = smov [#allocation9]   ;;  %s1315_s30 = smov [#allocation10]  }
  0x33   : > { %s233_s29 = sshll.u32 %s1314_s26, 4  ;;  %s246_s8 = sshll.u32 %s1315_s30, 4  ;;  %s234_s29 = int_to_ptr.vmem [resolvable:$true] %s233_s29  ;;  %s247_s8 = int_to_ptr.vmem [resolvable:$true] %s246_s8 }
  0x34   : > { %s1192_s11 = scalar_lea.vmem %s234_s29, 2048  ;;  %p1200_p11 = scmp.lt.s32.totalorder %s234_s29, %s234_s29 }
  0x35   : > { %p1193_p8 = scmp.ne.s32.totalorder %s234_s29, %s1192_s11  ;;  %p1201_p12 = scmp.lt.s32.totalorder %s1192_s11, %s1192_s11 }
  0x37   : > { %p1195_p9 = pnand %p1193_p8, %p1398_p6  ;;  %p1202_p13 = por %p1201_p12, %p1200_p11 }
  0x39   : > { %p1196_p10 = pneg %p1195_p9 }
  0x3b   : > { %p1203_p0 = pnand %p1202_p13, %p1196_p10 }
  0x3d   : > { %1206 = shalt.err (!%p1203_p0)
}
  0x3e   : > { %1043 = dma.hbm_to_vmem [thread:$0]  (!%p1388_p5), %s1604_s4, 2048, %s234_s29, [#allocation8], %s1312_s15, %s1312_s15, %s1313_s16  }
  0x3f   : > { %s1218_s13 = scalar_lea.vmem %s247_s8, 2048  ;;  %p1226_p8 = scmp.lt.s32.totalorder %s247_s8, %s247_s8 }
  0x40   : > { %p1219_p2 = scmp.ne.s32.totalorder %s247_s8, %s1218_s13  ;;  %p1227_p9 = scmp.lt.s32.totalorder %s1218_s13, %s1218_s13 }
  0x42   : > { %p1221_p4 = pnand %p1219_p2, %p1398_p6  ;;  %p1228_p10 = por %p1227_p9, %p1226_p8 }
  0x44   : > { %p1222_p7 = pneg %p1221_p4 }
  0x46   : > { %p1229_p11 = pnand %p1228_p10, %p1222_p7 }
  0x48   : > { %1232 = shalt.err (!%p1229_p11)
}
  0x49   : > { %1046 = dma.hbm_to_vmem [thread:$0]  (!%p1388_p5), %s1605_s5, 2048, %s247_s8, [#allocation11], %s1312_s15, %s1312_s15, %s1313_s16  }
  0x4a   : > { %s1460_s7 = sadd.s32 1, %s1307_s24   ;;  %s29_s18 = sadd.s32 1, %s1303_s23 }
  0x4b   : > { %s26_s10 = ssub.s32 %s1307_s24, %s1460_s7  ;;  %p36_p12 = scmp.ne.s32.totalorder %s1303_s23, %s1299_s22 }
  0x4c   : > { %p27_p6 = scmp.eq.s32.totalorder %s26_s10, 0  ;;  %p37_p13 = scmp.eq.s32.totalorder %s1307_s24, 0 }
  0x4d   : > { %p42_p0 = scmp.ne.s32.totalorder %s1299_s22, %s1295_s21  ;;  %p1056_p7 = scmp.lt.s32.totalorder %s1307_s24, 2 }
  0x4e   : > { %s1471_s19 = scalar_select %p27_p6, %s1303_s23, %s29_s18  }
  0x4f   : > { %p38_p2 = por %p37_p13, %p36_p12  ;;  %p1475_p4 = por %p1607_p1, %p42_p0 }
  0x50   : > { %s260_s25 = sand.u32 1, %s1303_s23   ;;  %s827_s16 = sshll.u32 %s1307_s24, 7 }
  0x51   : > { %s1613_s20 = scalar_select %p1475_p4, 1, 0 }
  0x52   : > { %s826_s15 = sshll.u32 %s260_s25, 3  ;;  %s1485_s30 = scalar_lea.hbm %s1600_s0, %s827_s16 }
  0x53   : > { %s264_s21 = scalar_lea.vmem [#allocation2], %s826_s15  ;;  %p1487_p5 = pnand %p1056_p7, %p38_p2 }
  0x54   : > { %s271_s8 = sshll.u32 %s264_s21, 4  ;;  %s261_s9 = scalar_lea.sflag [#allocation3], %s260_s25  ;;  %s272_s8 = int_to_ptr.vmem [resolvable:$true] %s271_s8 }
  0x55   : > { %s1233_s12 = scalar_lea.hbm %s1485_s30, 128  ;;  %p1235_p9 = pneg %p1487_p5 }
  0x56   : > { %p1234_p8 = scmp.ne.s32.totalorder %s1485_s30, %s1233_s12  ;;  %s1238_s14 = scalar_lea.hbm %s1600_s0, 256 }
  0x57   : > { %p1239_p6 = scmp.lt.s32.totalorder %s1485_s30, %s1600_s0  ;;  %p1240_p12 = scmp.lt.s32.totalorder %s1238_s14, %s1233_s12 }
  0x58   : > { %p1236_p10 = pnand %p1235_p9, %p1234_p8 }
  0x59   : > { %p1241_p13 = por %p1240_p12, %p1239_p6 }
  0x5a   : > { %p1237_p11 = pneg %p1236_p10 }
  0x5c   : > { %p1242_p0 = pnand %p1241_p13, %p1237_p11 }
  0x5e   : > { %1245 = shalt.err (!%p1242_p0)
}
  0x5f   : > { %s1246_s18 = scalar_lea.vmem %s272_s8, 128  ;;  %s1316_s25 = smov [#allocation2]  }
  0x60   : > { %p1247_p2 = scmp.ne.s32.totalorder %s272_s8, %s1246_s18  ;;  %s1251_s15 = sshll.u32 %s1316_s25, 4  ;;  %s1252_s15 = int_to_ptr.vmem [resolvable:$false] %s1251_s15 }
  0x61   : > { %s1253_s16 = scalar_lea.vmem %s1252_s15, 256  ;;  %p1254_p8 = scmp.lt.s32.totalorder %s272_s8, %s1252_s15 }
  0x62   : > { %p1249_p7 = pnand %p1247_p2, %p1235_p9  ;;  %p1255_p10 = scmp.lt.s32.totalorder %s1253_s16, %s1246_s18 }
  0x64   : > { %p1250_p1 = pneg %p1249_p7  ;;  %p1256_p4 = por %p1255_p10, %p1254_p8 }
  0x66   : > { %p1257_p3 = pnand %p1256_p4, %p1250_p1 }
  0x68   : > { %1260 = shalt.err (!%p1257_p3)
}
  0x69   : > { %1050 = dma.hbm_to_vmem [thread:$0]  (!%p1487_p5), %s1485_s30, 128, %s272_s8, %s261_s9  }
  0x6a   : > { %p1615_p11 = scmp.ne.s32.totalorder %s1610_s28, 0 }
  0x6b   : > { %s282_s26 = sand.u32 (!%p1615_p11), 1, %s1299_s22   ;;  %p1616_p9 = scmp.ne.s32.totalorder (!%p1615_p11), %s1613_s20, 0 }
  0x6c   : > { %280 = sbr.rel (%p1615_p11) target bundleno = 916 (0x394), region = 44  ;;  %s829_s29 = sshll.u32 (!%p1615_p11), %s282_s26, 3 }
  0x6d   : > { %s283_s21 = scalar_lea.sflag (!%p1615_p11), [#allocation3], %s282_s26  ;;  %s286_s12 = scalar_lea.vmem (!%p1615_p11), [#allocation2], %s829_s29 }
  0x71   : > { %1278 = dma.done.wait (%p1616_p9), %s283_s21, 128  }
  0x72   : > { %1280 = vsyncadd (%p1616_p9), %s283_s21, 4294967168  ;;  %p1617_p1 = scmp.eq.s32.totalorder %s1375_s27, 0 }
  0x74   : > { %1282 = dma.done.wait (%p1617_p1), [#allocation5], 320   ;;  %p1618_p3 = pmov %p1617_p1 }
  0x75   : > { %p1619_p4 = pmov %p1617_p1 }
  0x76   : > { %1284 = vsyncadd (%p1618_p3), [#allocation5], 4294966976 }
  0x77   : > { %1286 = dma.done.wait (%p1619_p4), [#allocation8], 4096   ;;  %p1620_p5 = pmov %p1617_p1 }
  0x78   : > { %p1621_p6 = pmov %p1617_p1 }
  0x79   : > { %1288 = vsyncadd (%p1620_p5), [#allocation8], 4294963200 }
  0x7a   : > { %1290 = dma.done.wait (%p1621_p6), [#allocation11], 2048   ;;  %p1622_p12 = pmov %p1617_p1 }
  0x7b   : > { %v1317_v0 = vmov 0.0   ;;  %vm1318_vm0 = vmmov 0   ;;  %v340_v1 = vld [vmem:[#allocation6 + $0x8] sm:$0xff]  ;;  %v339_v2 = vld [vmem:[#allocation6] sm:$0xff]  ;;  %vm348_vm1 = vcmask 130048   ;;  %v436_v6 = vld [vmem:[#allocation7 + $0x68] sm:$0xff] }
  0x7c   : > { %1292 = vsyncadd (%p1622_p12), [#allocation11], 4294965248  ;;  %897 = vmatprep.subr.mxu0 %v1317_v0  ;;  %901 = vmatprep.mubr.msk.f32.mxu0 %vm1318_vm0, %v1317_v0  ;;  %v338_v3 = vld [vmem:[%s286_s12] sm:$0xff]  ;;  %v437_v5 = vld [vmem:[#allocation7 + $0x70] sm:$0xff]  ;;  %p334_p13 = scmp.lt.s32.totalorder %s1375_s27, 1 }
  0x7d   : > { %904 = vmatprep.subr.mxu1 %v1317_v0  ;;  %936 = vmatprep.mubr.msk.f32.mxu1 %vm1318_vm0, %v1317_v0  ;;  %v438_v4 = vld [vmem:[#allocation7 + $0x78] sm:$0xff]  ;;  %v435_v7 = vld [vmem:[#allocation7 + $0x60] sm:$0xff]  ;;  %v433_v9 = vld [vmem:[#allocation7 + $0x50] sm:$0xff] }
  0x7e   : > { %898 = vmatpush3.msra.mxu0 %v340_v1  ;;  %905 = vmatpush3.msra.mxu1 %v438_v4  ;;  %v434_v8 = vld [vmem:[#allocation7 + $0x58] sm:$0xff]  ;;  %v432_v10 = vld [vmem:[#allocation7 + $0x48] sm:$0xff]  ;;  %v431_v11 = vld [vmem:[#allocation7 + $0x40] sm:$0xff]  ;;  %s1628_s27 = smov (!%p334_p13, %s1375_s27), 1 }
  0x7f   : > { %899 = vmatprep.subr.mxu0 %v1317_v0  ;;  %906 = vmatprep.subr.mxu1 %v1317_v0  ;;  %v430_v12 = vld [vmem:[#allocation7 + $0x38] sm:$0xff]  ;;  %v429_v13 = vld [vmem:[#allocation7 + $0x30] sm:$0xff]  ;;  %v428_v14 = vld [vmem:[#allocation7 + $0x28] sm:$0xff]  ;;  %s835_s28 = sshll.u32 %s1628_s27, 3 }
  0x80   : > { %900 = vmatpush3.msra.mxu0 %v339_v2  ;;  %907 = vmatpush3.msra.mxu1 %v437_v5  ;;  %v427_v15 = vld [vmem:[#allocation7 + $0x20] sm:$0xff]  ;;  %v426_v16 = vld [vmem:[#allocation7 + $0x18] sm:$0xff]  ;;  %v425_v17 = vld [vmem:[#allocation7 + $0x10] sm:$0xff]  ;;  %s337_s8 = scalar_lea.vmem %s1606_s6, %s835_s28 }
  0x81   : > { %902 = vmatmul.mubr.msk.f32.vlgmr.msra.gmra.mxu0 %vm348_vm1, %v338_v3  ;;  %908 = vmatprep.subr.mxu1 %v1317_v0  ;;  %v424_v18 = vld [vmem:[#allocation7 + $0x8] sm:$0xff]  ;;  %v423_v19 = vld [vmem:[#allocation7] sm:$0xff]  ;;  %v532_v20 = vld [vmem:[#allocation9 + $0x78] sm:$0xff] }
  0x82   : > { %939 = vmatprep.subr.mxu0 %v1317_v0  ;;  %909 = vmatpush3.msra.mxu1 %v436_v6  ;;  %v531_v21 = vld [vmem:[#allocation9 + $0x70] sm:$0xff]  ;;  %v530_v22 = vld [vmem:[#allocation9 + $0x68] sm:$0xff]  ;;  %v529_v23 = vld [vmem:[#allocation9 + $0x60] sm:$0xff] }
  0x83   : > { %971 = vmatprep.mubr.msk.f32.mxu0 %vm1318_vm0, %v1317_v0  ;;  %910 = vmatprep.subr.mxu1 %v1317_v0  ;;  %v528_v24 = vld [vmem:[#allocation9 + $0x58] sm:$0xff]  ;;  %v527_v25 = vld [vmem:[#allocation9 + $0x50] sm:$0xff]  ;;  %v526_v26 = vld [vmem:[#allocation9 + $0x48] sm:$0xff] }
  0x84   : > { %911 = vmatpush3.msra.mxu1 %v435_v7  ;;  %940 = vmatpush3.msra.mxu0 %v532_v20  ;;  %v525_v27 = vld [vmem:[#allocation9 + $0x40] sm:$0xff]  ;;  %v524_v28 = vld [vmem:[#allocation9 + $0x38] sm:$0xff]  ;;  %v523_v29 = vld [vmem:[#allocation9 + $0x30] sm:$0xff] }
  0x85   : > { %912 = vmatprep.subr.mxu1 %v1317_v0  ;;  %941 = vmatprep.subr.mxu0 %v1317_v0  ;;  %v522_v30 = vld [vmem:[#allocation9 + $0x28] sm:$0xff]  ;;  %v521_v31 = vld [vmem:[#allocation9 + $0x20] sm:$0xff]  ;;  %v520_v32 = vld [vmem:[#allocation9 + $0x18] sm:$0xff] }
  0x86   : > { %913 = vmatpush3.msra.mxu1 %v434_v8  ;;  %942 = vmatpush3.msra.mxu0 %v531_v21  ;;  %v836_v33 = vld [vmem:[#allocation4] ss:$0 sm:$0xff]  ;;  %v519_v38 = vld [vmem:[#allocation9 + $0x10] sm:$0xff]  ;;  %v517_v40 = vld [vmem:[#allocation9] sm:$0xff] }
  0x87   : > { %914 = vmatprep.subr.mxu1 %v1317_v0  ;;  %943 = vmatprep.subr.mxu0 %v1317_v0  ;;  %v518_v39 = vld [vmem:[#allocation9 + $0x8] sm:$0xff]  ;;  %v626_v41 = vld [vmem:[#allocation10 + $0x78] sm:$0xff]  ;;  %v625_v42 = vld [vmem:[#allocation10 + $0x70] sm:$0xff] }
  0x88   : > { %915 = vmatpush3.msra.mxu1 %v433_v9  ;;  %944 = vmatpush3.msra.mxu0 %v530_v22  ;;  %v624_v43 = vld [vmem:[#allocation10 + $0x68] sm:$0xff]  ;;  %v623_v44 = vld [vmem:[#allocation10 + $0x60] sm:$0xff]  ;;  %v622_v45 = vld [vmem:[#allocation10 + $0x58] sm:$0xff] }
  0x89   : > { %916 = vmatprep.subr.mxu1 %v1317_v0  ;;  %945 = vmatprep.subr.mxu0 %v1317_v0  ;;  %v621_v46 = vld [vmem:[#allocation10 + $0x50] sm:$0xff]  ;;  %v620_v47 = vld [vmem:[#allocation10 + $0x48] sm:$0xff]  ;;  %v619_v48 = vld [vmem:[#allocation10 + $0x40] sm:$0xff] }
  0x8a   : > { %917 = vmatpush3.msra.mxu1 %v432_v10  ;;  %946 = vmatpush3.msra.mxu0 %v529_v23  ;;  %v618_v49 = vld [vmem:[#allocation10 + $0x38] sm:$0xff]  ;;  %v617_v50 = vld [vmem:[#allocation10 + $0x30] sm:$0xff]  ;;  %v616_v51 = vld [vmem:[#allocation10 + $0x28] sm:$0xff] }
  0x8b   : > { %918 = vmatprep.subr.mxu1 %v1317_v0  ;;  %947 = vmatprep.subr.mxu0 %v1317_v0  ;;  %v615_v52 = vld [vmem:[#allocation10 + $0x20] sm:$0xff]  ;;  %v614_v53 = vld [vmem:[#allocation10 + $0x18] sm:$0xff]  ;;  %v838_v54 = vld [vmem:[#allocation4 + $0x1] ss:$0 sm:$0xff] }
  0x8c   : > { %919 = vmatpush3.msra.mxu1 %v431_v11  ;;  %948 = vmatpush3.msra.mxu0 %v528_v24  ;;  %v613_v59 = vld [vmem:[#allocation10 + $0x10] sm:$0xff]  ;;  %v612_v60 = vld [vmem:[#allocation10 + $0x8] sm:$0xff]  ;;  %v611_v61 = vld [vmem:[#allocation10] sm:$0xff] }
  0x8d   : > { %920 = vmatprep.subr.mxu1 %v1317_v0  ;;  %949 = vmatprep.subr.mxu0 %v1317_v0  ;;  %v839_v62 = vld [vmem:[#allocation4 + $0x2] ss:$0 sm:$0xff]  ;;  %v840_v4 = vld [vmem:[#allocation4 + $0x3] ss:$0 sm:$0xff] }
  0x8e   : > { %921 = vmatpush3.msra.mxu1 %v430_v12  ;;  %950 = vmatpush3.msra.mxu0 %v527_v25 }
  0x8f   : > { %922 = vmatprep.subr.mxu1 %v1317_v0  ;;  %951 = vmatprep.subr.mxu0 %v1317_v0 }
  0x90   : > { %923 = vmatpush3.msra.mxu1 %v429_v13  ;;  %952 = vmatpush3.msra.mxu0 %v526_v26 }
  0x91   : > { %924 = vmatprep.subr.mxu1 %v1317_v0  ;;  %953 = vmatprep.subr.mxu0 %v1317_v0 }
  0x92   : > { %925 = vmatpush3.msra.mxu1 %v428_v14  ;;  %954 = vmatpush3.msra.mxu0 %v525_v27 }
  0x93   : > { %926 = vmatprep.subr.mxu1 %v1317_v0  ;;  %955 = vmatprep.subr.mxu0 %v1317_v0 }
  0x94   : > { %927 = vmatpush3.msra.mxu1 %v427_v15  ;;  %956 = vmatpush3.msra.mxu0 %v524_v28 }
  0x95   : > { %928 = vmatprep.subr.mxu1 %v1317_v0  ;;  %957 = vmatprep.subr.mxu0 %v1317_v0 }
  0x96   : > { %929 = vmatpush3.msra.mxu1 %v426_v16  ;;  %958 = vmatpush3.msra.mxu0 %v523_v29 }
  0x97   : > { %930 = vmatprep.subr.mxu1 %v1317_v0  ;;  %959 = vmatprep.subr.mxu0 %v1317_v0 }
  0x98   : > { %931 = vmatpush3.msra.mxu1 %v425_v17  ;;  %960 = vmatpush3.msra.mxu0 %v522_v30 }
  0x99   : > { %932 = vmatprep.subr.mxu1 %v1317_v0  ;;  %961 = vmatprep.subr.mxu0 %v1317_v0 }
  0x9a   : > { %933 = vmatpush3.msra.mxu1 %v424_v18  ;;  %962 = vmatpush3.msra.mxu0 %v521_v31 }
  0x9b   : > { %934 = vmatprep.subr.mxu1 %v1317_v0  ;;  %963 = vmatprep.subr.mxu0 %v1317_v0 }
  0x9c   : > { %935 = vmatpush3.msra.mxu1 %v423_v19  ;;  %964 = vmatpush3.msra.mxu0 %v520_v32 }
  0x9d   : > { %974 = vmatprep.subr.mxu1 %v1317_v0  ;;  %965 = vmatprep.subr.mxu0 %v1317_v0 }
  0x9e   : > { %966 = vmatpush3.msra.mxu0 %v519_v38 }
  0x9f   : > { %967 = vmatprep.subr.mxu0 %v1317_v0 }
  0xa0   : > { %968 = vmatpush3.msra.mxu0 %v518_v39 }
  0xa1   : > { %969 = vmatprep.subr.mxu0 %v1317_v0 }
  0xa2   : > { %970 = vmatpush3.msra.mxu0 %v517_v40 }
 0x141   : > { %v418_v34 = vpop.f32.mrf.mxu0 }
 0x142   : > { %v419_v35 = vadd.f32 %v836_v33, %v418_v34 }
 0x143   : > { %v903_v36 = vpop.f32.mrf.mxu0 }
 0x144   : > { %v422_v37 = vmax.f32 %v419_v35, 0.0 }
 0x146   : > { %937 = vmatmul.mubr.f32.vlgmr.msra.gmra.mxu1 %v422_v37 }
 0x147   : > { %1006 = vmatprep.mubr.msk.f32.mxu1 %vm1318_vm0, %v1317_v0  ;;  %975 = vmatpush3.msra.mxu1 %v626_v41 }
 0x148   : > { %976 = vmatprep.subr.mxu1 %v1317_v0 }
 0x149   : > { %977 = vmatpush3.msra.mxu1 %v625_v42 }
 0x14a   : > { %978 = vmatprep.subr.mxu1 %v1317_v0 }
 0x14b   : > { %979 = vmatpush3.msra.mxu1 %v624_v43 }
 0x14c   : > { %980 = vmatprep.subr.mxu1 %v1317_v0 }
 0x14d   : > { %981 = vmatpush3.msra.mxu1 %v623_v44 }
 0x14e   : > { %982 = vmatprep.subr.mxu1 %v1317_v0 }
 0x14f   : > { %983 = vmatpush3.msra.mxu1 %v622_v45 }
 0x150   : > { %984 = vmatprep.subr.mxu1 %v1317_v0 }
 0x151   : > { %985 = vmatpush3.msra.mxu1 %v621_v46 }
 0x152   : > { %986 = vmatprep.subr.mxu1 %v1317_v0 }
 0x153   : > { %987 = vmatpush3.msra.mxu1 %v620_v47 }
 0x154   : > { %988 = vmatprep.subr.mxu1 %v1317_v0 }
 0x155   : > { %989 = vmatpush3.msra.mxu1 %v619_v48 }
 0x156   : > { %990 = vmatprep.subr.mxu1 %v1317_v0 }
 0x157   : > { %991 = vmatpush3.msra.mxu1 %v618_v49 }
 0x158   : > { %992 = vmatprep.subr.mxu1 %v1317_v0 }
 0x159   : > { %993 = vmatpush3.msra.mxu1 %v617_v50 }
 0x15a   : > { %994 = vmatprep.subr.mxu1 %v1317_v0 }
 0x15b   : > { %995 = vmatpush3.msra.mxu1 %v616_v51 }
 0x15c   : > { %996 = vmatprep.subr.mxu1 %v1317_v0 }
 0x15d   : > { %997 = vmatpush3.msra.mxu1 %v615_v52 }
 0x15e   : > { %998 = vmatprep.subr.mxu1 %v1317_v0 }
 0x15f   : > { %999 = vmatpush3.msra.mxu1 %v614_v53 }
 0x160   : > { %1000 = vmatprep.subr.mxu1 %v1317_v0 }
 0x161   : > { %1001 = vmatpush3.msra.mxu1 %v613_v59 }
 0x162   : > { %1002 = vmatprep.subr.mxu1 %v1317_v0 }
 0x163   : > { %1003 = vmatpush3.msra.mxu1 %v612_v60 }
 0x164   : > { %1004 = vmatprep.subr.mxu1 %v1317_v0 }
 0x165   : > { %1005 = vmatpush3.msra.mxu1 %v611_v61 }
 0x206   : > { %v512_v55 = vpop.f32.mrf.mxu1 }
 0x207   : > { %v513_v56 = vadd.f32 %v838_v54, %v512_v55 }
 0x208   : > { %v938_v57 = vpop.f32.mrf.mxu1 }
 0x209   : > { %v516_v58 = vmax.f32 %v513_v56, 0.0 }
 0x20b   : > { %972 = vmatmul.mubr.f32.vlgmr.msra.gmra.mxu0 %v516_v58 }
 0x2cb   : > { %v606_v63 = vpop.f32.mrf.mxu0 }
 0x2cc   : > { %v607_v1 = vadd.f32 %v839_v62, %v606_v63 }
 0x2cd   : > { %v973_v2 = vpop.f32.mrf.mxu0 }
 0x2ce   : > { %v610_v3 = vmax.f32 %v607_v1, 0.0 }
 0x2d0   : > { %1007 = vmatmul.mubr.f32.vlgmr.msra.gmra.mxu1 %v610_v3 }
 0x390   : > { %v700_v5 = vpop.f32.mrf.mxu1 }
 0x391   : > { %v701_v6 = vadd.f32 %v840_v4, %v700_v5 }
 0x392   : > { %v1008_v7 = vpop.f32.mrf.mxu1 }
 0x393   : > { %704 = vst [vmem:[%s337_s8] sm:$0xff] %v701_v6 }
 0x394 PF: > { %p19_p0 = scmp.ge.s32.totalorder %s1460_s7, 4   ;;  %s1623_s21 = smov %s1299_s22 }
 0x395   : > { %s1624_s22 = smov %s1303_s23  ;;  %s1625_s23 = smov %s1471_s19 }
 0x396   : > { %s1626_s24 = smov %s1460_s7  ;;  %21 = sbr.rel (!%p19_p0) target bundleno = 6 (0x6), region = 104 }
 0x39b   :  { %724 = vsyncpa [#allocation3], 1 }
 0x39c   :  { %726 = vsyncpa [#allocation3 + $0x1], 1 }
 0x39d   :  { %727 = vsyncpa [#allocation5], 1 }
 0x39e   :  { %728 = vsyncpa [#allocation8], 1 }
 0x39f   :  { %729 = vsyncpa [#allocation11], 1 }

</bundles_post_ra>
